<compile_context>
chip_gen: v7x
topology: tpu7x:2x2x1
jax: 0.10.0
libtpu: 0.0.40
codegen_flags: <defaults>
</compile_context>

<pallas_src>
import jax
import jax.numpy as jnp
from jax import lax
from jax.experimental import pallas as pl
from jax.experimental.pallas import tpu as pltpu


_TAPS = [(dy, dx) for dy in (-1, 0, 1) for dx in (-1, 0, 1)]  # tap t = ky*3+kx


def _make_kernel(H, W):
    HW = H * W

    def kernel(x_ref, y_ref, rtl_ref, mask_ref, w1_ref, w2_ref, b_ref,
               ltail_ref, o_ref):
        f32 = jnp.float32
        X = x_ref[0].astype(f32)                       # (C, HW)   lane-dense pixels
        Y = y_ref[0].astype(f32)                       # (8, HW)   [Y65(3); YA(3); 0(2)]

        # Both colour projections in one MXU call, then the stacked residual.
        res = jnp.dot(rtl_ref[...].astype(f32), X,
                      preferred_element_type=f32) - Y  # (8, HW)

        # 3x3 "same" conv on the 3-channel residuals of BOTH branches:
        # 9 lane-rolls (XLU, free slot) + border masks, stacked to (72, HW).
        pieces = []
        for t, (dy, dx) in enumerate(_TAPS):
            s = dy * W + dx
            sh = res if s == 0 else pltpu.roll(res, shift=(-s) % HW, axis=1)
            if s != 0:
                sh = sh * mask_ref[t].astype(f32)      # (1,HW) mask broadcasts
            pieces.append(sh)
        stack = jnp.concatenate(pieces, axis=0)        # (72, HW)

        # conv1 (all 9 taps, both branches) as ONE matmul, then 1x1 conv with
        # the conv1 bias folded in, then ReLU.
        acc = jnp.dot(w1_ref[...].astype(f32), stack,
                      preferred_element_type=f32)      # (2*band, HW)
        h = jnp.maximum(
            jnp.dot(w2_ref[...].astype(f32), acc,
                    preferred_element_type=f32) + b_ref[...].astype(f32),
            0.0)                                       # (2*band, HW)

        # Tail: [L65^T | LA^T] @ [h65; hA]  ==  Inv65 + InvA in one matmul.
        inv_sum = jnp.dot(ltail_ref[...].astype(f32), h,
                          preferred_element_type=f32)  # (C, HW)

        o_ref[0] = (X - 0.3 * inv_sum).astype(o_ref.dtype)

    return kernel


def model_block_forward(x, y_65, y_a, R_, L65, LA, w1, b1, w2, b2):
    """Pallas implementation of ModelBlock.forward.

    x:    (N, C, H, W) HSI input (the PyTorch module is batch-1 by construction)
    y_65, y_a: (N, 3, H, W) RGB under D65 / illuminant A
    R_: (C, 3);  L65, LA: (C, C)
    w1: (band, 3, 3, 3), b1: (band,)  -- conv1 (3x3, padding=1)
    w2: (band, band),    b2: (band,)  -- conv2 (1x1)
    """
    N, C, H, W = x.shape
    HW = H * W
    band = w1.shape[0]
    assert band == C, "ModelBlock's algebra requires band == HSI channel count"
    f32 = jnp.float32

    x_f = x.reshape(N, C, HW)
    # Stack [Y65; YA; 0; 0] -> 8 rows so every roll/concat is sublane-aligned.
    y_stack = jnp.concatenate(
        [y_65.reshape(N, 3, HW).astype(f32),
         y_a.reshape(N, 3, HW).astype(f32),
         jnp.zeros((N, 2, HW), f32)], axis=1)                      # (N, 8, HW)

    # ---- constant folding in the wrapper (all hoisted out of the kernel) ----
    L65 = jnp.asarray(L65, f32)
    LA = jnp.asarray(LA, f32)
    R_ = jnp.asarray(R_, f32)
    # r = R^T L^T X = (L @ R)^T @ X  -> fold R into L, both branches stacked.
    rtl8 = jnp.concatenate([(L65 @ R_).T, (LA @ R_).T,
                            jnp.zeros((2, C), f32)], axis=0)       # (8, C)

    # conv1 taps as a single (2*band, 72) block-diagonal matrix over the
    # padded 8-row residual stack: columns t*8+{0,1,2} = branch D65,
    # t*8+{3,4,5} = branch A, t*8+{6,7} = padding (zero).
    w1_taps = jnp.transpose(jnp.asarray(w1, f32), (0, 2, 3, 1)) \
                 .reshape(band, 9, 3)                              # (o, tap, in)
    z3 = jnp.zeros((band, 9, 3), f32)
    z2 = jnp.zeros((band, 9, 2), f32)
    w1_big = jnp.concatenate(
        [jnp.concatenate([w1_taps, z3, z2], axis=2),
         jnp.concatenate([z3, w1_taps, z2], axis=2)],
        axis=0).reshape(2 * band, 72)                              # (2b, 72)

    w2 = jnp.asarray(w2, f32)
    zb = jnp.zeros((band, band), f32)
    w2_big = jnp.concatenate(
        [jnp.concatenate([w2, zb], axis=1),
         jnp.concatenate([zb, w2], axis=1)], axis=0)               # (2b, 2b)
    # Fold conv1 bias into conv2 (valid: no nonlinearity between conv1/conv2).
    b_fused = w2 @ jnp.asarray(b1, f32) + jnp.asarray(b2, f32)
    b_big = jnp.concatenate([b_fused, b_fused]).reshape(2 * band, 1)

    ltail = jnp.concatenate([L65.T, LA.T], axis=1)                 # (C, 2b)

    # Border-validity masks for the 9 taps (tiny: 9*HW floats).
    p = jnp.arange(HW)
    yy, xx = p // W, p % W
    masks = jnp.stack(
        [((yy + dy >= 0) & (yy + dy < H) &
          (xx + dx >= 0) & (xx + dx < W)).astype(f32)
         for dy, dx in _TAPS], axis=0).reshape(9, 1, HW)

    kernel = _make_kernel(H, W)
    out_f = pl.pallas_call(
        kernel,
        out_shape=jax.ShapeDtypeStruct((N, C, HW), x.dtype),
        grid_spec=pltpu.PrefetchScalarGridSpec(
            num_scalar_prefetch=0,
            grid=(N,),
            in_specs=[
                pl.BlockSpec((1, C, HW), lambda i: (i, 0, 0)),        # x
                pl.BlockSpec((1, 8, HW), lambda i: (i, 0, 0)),        # [Y65;YA;0]
                pl.BlockSpec((8, C), lambda i: (0, 0)),               # (L@R)^T stack
                pl.BlockSpec((9, 1, HW), lambda i: (0, 0, 0)),        # border masks
                pl.BlockSpec((2 * band, 72), lambda i: (0, 0)),       # conv1 taps
                pl.BlockSpec((2 * band, 2 * band), lambda i: (0, 0)), # conv2 (blkdiag)
                pl.BlockSpec((2 * band, 1), lambda i: (0, 0)),        # fused bias
                pl.BlockSpec((C, 2 * band), lambda i: (0, 0)),        # [L65^T|LA^T]
            ],
            out_specs=pl.BlockSpec((1, C, HW), lambda i: (i, 0, 0)),
        ),
        compiler_params=pltpu.CompilerParams(
            dimension_semantics=("parallel",)),
    )(x_f, y_stack, rtl8, masks, w1_big, w2_big, b_big, ltail)
    return out_f.reshape(N, C, H, W)


def _reference_forward(x, y_65, y_a, R_, L65, LA, w1, b1, w2, b2):
    """Pure-JAX mirror of the PyTorch ModelBlock.forward (batch-1 semantics)."""
    hp = lax.Precision.HIGHEST

    def Lop(h, M):
        return jnp.einsum("nchw,ck->nkhw", h, M, precision=hp)

    def Rop(h):
        return jnp.einsum("nchw,ck->nkhw", h, R_, precision=hp)

    def RT(h):
        c1 = lax.conv_general_dilated(
            h, w1, window_strides=(1, 1), padding=((1, 1), (1, 1)),
            dimension_numbers=("NCHW", "OIHW", "NCHW"), precision=hp)
        c1 = c1 + b1[None, :, None, None]
        c2 = jnp.einsum("nchw,oc->nohw", c1, w2, precision=hp)
        c2 = c2 + b2[None, :, None, None]
        return jnp.maximum(c2, 0.0)

    res65 = Rop(Lop(x, L65)) - y_65
    resa = Rop(Lop(x, LA)) - y_a
    inv65 = Lop(RT(res65), L65)
    inva = Lop(RT(resa), LA)
    return x - 0.3 * (inva + inv65)


if __name__ == "__main__":
    key = jax.random.PRNGKey(0)
    ks = jax.random.split(key, 10)

    # The PyTorch module uses HSI[0] / unsqueeze(0) -> it is a batch-1 block.
    N, C, H, W = 1, 8, 16, 16
    band = C  # required by the module's algebra

    x = jax.random.normal(ks[0], (N, C, H, W), jnp.float32)
    y_65 = jax.random.normal(ks[1], (N, 3, H, W), jnp.float32)
    y_a = jax.random.normal(ks[2], (N, 3, H, W), jnp.float32)
    R_ = jax.random.normal(ks[3], (C, 3), jnp.float32) / jnp.sqrt(C * 1.0)
    L65 = jax.random.normal(ks[4], (C, C), jnp.float32) / jnp.sqrt(C * 1.0)
    LA = jax.random.normal(ks[5], (C, C), jnp.float32) / jnp.sqrt(C * 1.0)
    w1 = jax.random.normal(ks[6], (band, 3, 3, 3), jnp.float32) * 0.1
    b1 = jax.random.normal(ks[7], (band,), jnp.float32) * 0.1
    w2 = jax.random.normal(ks[8], (band, band), jnp.float32) / jnp.sqrt(band * 1.0)
    b2 = jax.random.normal(ks[9], (band,), jnp.float32) * 0.1

    out = model_block_forward(x, y_65, y_a, R_, L65, LA, w1, b1, w2, b2)
    out = jax.block_until_ready(out)

    ref = _reference_forward(x, y_65, y_a, R_, L65, LA, w1, b1, w2, b2)
    ref = jax.block_until_ready(ref)

    assert out.shape == (N, C, H, W)
    err = float(jnp.max(jnp.abs(out - ref)))
    assert jnp.allclose(out, ref, atol=1e-3, rtol=1e-3), "max abs err = %g" % err

    print("KERNEL_OK")
</pallas_src>

<mosaic_0001>
module attributes {stable_mosaic.version = 11 : i64} {
  func.func @kernel(%arg0: i32, %arg1: memref<1x8x256xf32, #tpu.memory_space<vmem>>, %arg2: memref<1x8x256xf32, #tpu.memory_space<vmem>>, %arg3: memref<8x8xf32, #tpu.memory_space<vmem>>, %arg4: memref<9x1x256xf32, #tpu.memory_space<vmem>>, %arg5: memref<16x72xf32, #tpu.memory_space<vmem>>, %arg6: memref<16x16xf32, #tpu.memory_space<vmem>>, %arg7: memref<16x1xf32, #tpu.memory_space<vmem>>, %arg8: memref<8x16xf32, #tpu.memory_space<vmem>>, %arg9: memref<1x8x256xf32, #tpu.memory_space<vmem>>) attributes {dimension_semantics = [#tpu.dimension_semantics<parallel>], iteration_bounds = array<i64: 1>, scalar_prefetch = 0 : i64, scratch_operands = 0 : i64, tpu.core_type = #tpu.core_type<tc>, window_params = [{transform_indices = @transform_0, window_bounds = array<i64: 1, 8, 256>}, {transform_indices = @transform_1, window_bounds = array<i64: 1, 8, 256>}, {pipeline_mode = #tpu.pipeline_mode<synchronous>, transform_indices = @transform_2, window_bounds = array<i64: 8, 8>}, {pipeline_mode = #tpu.pipeline_mode<synchronous>, transform_indices = @transform_3, window_bounds = array<i64: 9, 1, 256>}, {pipeline_mode = #tpu.pipeline_mode<synchronous>, transform_indices = @transform_4, window_bounds = array<i64: 16, 72>}, {pipeline_mode = #tpu.pipeline_mode<synchronous>, transform_indices = @transform_5, window_bounds = array<i64: 16, 16>}, {pipeline_mode = #tpu.pipeline_mode<synchronous>, transform_indices = @transform_6, window_bounds = array<i64: 16, 1>}, {pipeline_mode = #tpu.pipeline_mode<synchronous>, transform_indices = @transform_7, window_bounds = array<i64: 8, 16>}, {transform_indices = @transform_8, window_bounds = array<i64: 1, 8, 256>}]} {
    %c0 = arith.constant 0 : index
    %c0_0 = arith.constant 0 : index
    %c0_1 = arith.constant 0 : index
    %0 = vector.load %arg1[%c0, %c0_0, %c0_1] : memref<1x8x256xf32, #tpu.memory_space<vmem>>, vector<1x8x256xf32>
    %1 = vector.shape_cast %0 : vector<1x8x256xf32> to vector<8x256xf32>
    %c0_2 = arith.constant 0 : index
    %c0_3 = arith.constant 0 : index
    %c0_4 = arith.constant 0 : index
    %2 = vector.load %arg2[%c0_2, %c0_3, %c0_4] : memref<1x8x256xf32, #tpu.memory_space<vmem>>, vector<1x8x256xf32>
    %3 = vector.shape_cast %2 : vector<1x8x256xf32> to vector<8x256xf32>
    %c0_5 = arith.constant 0 : index
    %c0_6 = arith.constant 0 : index
    %4 = vector.load %arg3[%c0_5, %c0_6] : memref<8x8xf32, #tpu.memory_space<vmem>>, vector<8x8xf32>
    %cst = arith.constant dense<0.000000e+00> : vector<8x256xf32>
    %5 = tpu.matmul %4, %1, %cst {dimension_numbers = #tpu.dot_dimension_numbers<[1], [0], [0], [1], [0, 0, 1, 1], [], []>} : vector<8x8xf32>, vector<8x256xf32>, vector<8x256xf32> -> vector<8x256xf32>
    %6 = arith.subf %5, %3 : vector<8x256xf32>
    %c17_i32 = arith.constant 17 : i32
    %7 = tpu.dynamic_rotate %6 by %c17_i32 dim 1 : vector<8x256xf32>, i32 -> vector<8x256xf32>
    %c0_7 = arith.constant 0 : index
    %c0_8 = arith.constant 0 : index
    %c0_9 = arith.constant 0 : index
    %8 = vector.load %arg4[%c0_7, %c0_8, %c0_9] : memref<9x1x256xf32, #tpu.memory_space<vmem>>, vector<1x1x256xf32>
    %9 = vector.shape_cast %8 : vector<1x1x256xf32> to vector<1x256xf32>
    %10 = vector.broadcast %9 : vector<1x256xf32> to vector<8x256xf32>
    %11 = arith.mulf %7, %10 : vector<8x256xf32>
    %c16_i32 = arith.constant 16 : i32
    %12 = tpu.dynamic_rotate %6 by %c16_i32 dim 1 : vector<8x256xf32>, i32 -> vector<8x256xf32>
    %c1 = arith.constant 1 : index
    %c0_10 = arith.constant 0 : index
    %c0_11 = arith.constant 0 : index
    %13 = vector.load %arg4[%c1, %c0_10, %c0_11] : memref<9x1x256xf32, #tpu.memory_space<vmem>>, vector<1x1x256xf32>
    %14 = vector.shape_cast %13 : vector<1x1x256xf32> to vector<1x256xf32>
    %15 = vector.broadcast %14 : vector<1x256xf32> to vector<8x256xf32>
    %16 = arith.mulf %12, %15 : vector<8x256xf32>
    %c15_i32 = arith.constant 15 : i32
    %17 = tpu.dynamic_rotate %6 by %c15_i32 dim 1 : vector<8x256xf32>, i32 -> vector<8x256xf32>
    %c2 = arith.constant 2 : index
    %c0_12 = arith.constant 0 : index
    %c0_13 = arith.constant 0 : index
    %18 = vector.load %arg4[%c2, %c0_12, %c0_13] : memref<9x1x256xf32, #tpu.memory_space<vmem>>, vector<1x1x256xf32>
    %19 = vector.shape_cast %18 : vector<1x1x256xf32> to vector<1x256xf32>
    %20 = vector.broadcast %19 : vector<1x256xf32> to vector<8x256xf32>
    %21 = arith.mulf %17, %20 : vector<8x256xf32>
    %c1_i32 = arith.constant 1 : i32
    %22 = tpu.dynamic_rotate %6 by %c1_i32 dim 1 : vector<8x256xf32>, i32 -> vector<8x256xf32>
    %c3 = arith.constant 3 : index
    %c0_14 = arith.constant 0 : index
    %c0_15 = arith.constant 0 : index
    %23 = vector.load %arg4[%c3, %c0_14, %c0_15] : memref<9x1x256xf32, #tpu.memory_space<vmem>>, vector<1x1x256xf32>
    %24 = vector.shape_cast %23 : vector<1x1x256xf32> to vector<1x256xf32>
    %25 = vector.broadcast %24 : vector<1x256xf32> to vector<8x256xf32>
    %26 = arith.mulf %22, %25 : vector<8x256xf32>
    %c255_i32 = arith.constant 255 : i32
    %27 = tpu.dynamic_rotate %6 by %c255_i32 dim 1 : vector<8x256xf32>, i32 -> vector<8x256xf32>
    %c5 = arith.constant 5 : index
    %c0_16 = arith.constant 0 : index
    %c0_17 = arith.constant 0 : index
    %28 = vector.load %arg4[%c5, %c0_16, %c0_17] : memref<9x1x256xf32, #tpu.memory_space<vmem>>, vector<1x1x256xf32>
    %29 = vector.shape_cast %28 : vector<1x1x256xf32> to vector<1x256xf32>
    %30 = vector.broadcast %29 : vector<1x256xf32> to vector<8x256xf32>
    %31 = arith.mulf %27, %30 : vector<8x256xf32>
    %c241_i32 = arith.constant 241 : i32
    %32 = tpu.dynamic_rotate %6 by %c241_i32 dim 1 : vector<8x256xf32>, i32 -> vector<8x256xf32>
    %c6 = arith.constant 6 : index
    %c0_18 = arith.constant 0 : index
    %c0_19 = arith.constant 0 : index
    %33 = vector.load %arg4[%c6, %c0_18, %c0_19] : memref<9x1x256xf32, #tpu.memory_space<vmem>>, vector<1x1x256xf32>
    %34 = vector.shape_cast %33 : vector<1x1x256xf32> to vector<1x256xf32>
    %35 = vector.broadcast %34 : vector<1x256xf32> to vector<8x256xf32>
    %36 = arith.mulf %32, %35 : vector<8x256xf32>
    %c240_i32 = arith.constant 240 : i32
    %37 = tpu.dynamic_rotate %6 by %c240_i32 dim 1 : vector<8x256xf32>, i32 -> vector<8x256xf32>
    %c7 = arith.constant 7 : index
    %c0_20 = arith.constant 0 : index
    %c0_21 = arith.constant 0 : index
    %38 = vector.load %arg4[%c7, %c0_20, %c0_21] : memref<9x1x256xf32, #tpu.memory_space<vmem>>, vector<1x1x256xf32>
    %39 = vector.shape_cast %38 : vector<1x1x256xf32> to vector<1x256xf32>
    %40 = vector.broadcast %39 : vector<1x256xf32> to vector<8x256xf32>
    %41 = arith.mulf %37, %40 : vector<8x256xf32>
    %c239_i32 = arith.constant 239 : i32
    %42 = tpu.dynamic_rotate %6 by %c239_i32 dim 1 : vector<8x256xf32>, i32 -> vector<8x256xf32>
    %c8 = arith.constant 8 : index
    %c0_22 = arith.constant 0 : index
    %c0_23 = arith.constant 0 : index
    %43 = vector.load %arg4[%c8, %c0_22, %c0_23] : memref<9x1x256xf32, #tpu.memory_space<vmem>>, vector<1x1x256xf32>
    %44 = vector.shape_cast %43 : vector<1x1x256xf32> to vector<1x256xf32>
    %45 = vector.broadcast %44 : vector<1x256xf32> to vector<8x256xf32>
    %46 = arith.mulf %42, %45 : vector<8x256xf32>
    %47 = tpu.concatenate %11, %16, %21, %26, %6, %31, %36, %41, %46 in 0 : vector<8x256xf32>, vector<8x256xf32>, vector<8x256xf32>, vector<8x256xf32>, vector<8x256xf32>, vector<8x256xf32>, vector<8x256xf32>, vector<8x256xf32>, vector<8x256xf32> -> vector<72x256xf32>
    %c0_24 = arith.constant 0 : index
    %c0_25 = arith.constant 0 : index
    %48 = vector.load %arg5[%c0_24, %c0_25] : memref<16x72xf32, #tpu.memory_space<vmem>>, vector<16x72xf32>
    %cst_26 = arith.constant dense<0.000000e+00> : vector<16x256xf32>
    %49 = tpu.matmul %48, %47, %cst_26 {dimension_numbers = #tpu.dot_dimension_numbers<[1], [0], [0], [1], [0, 0, 1, 1], [], []>} : vector<16x72xf32>, vector<72x256xf32>, vector<16x256xf32> -> vector<16x256xf32>
    %c0_27 = arith.constant 0 : index
    %c0_28 = arith.constant 0 : index
    %50 = vector.load %arg6[%c0_27, %c0_28] : memref<16x16xf32, #tpu.memory_space<vmem>>, vector<16x16xf32>
    %cst_29 = arith.constant dense<0.000000e+00> : vector<16x256xf32>
    %51 = tpu.matmul %50, %49, %cst_29 {dimension_numbers = #tpu.dot_dimension_numbers<[1], [0], [0], [1], [0, 0, 1, 1], [], []>} : vector<16x16xf32>, vector<16x256xf32>, vector<16x256xf32> -> vector<16x256xf32>
    %c0_30 = arith.constant 0 : index
    %c0_31 = arith.constant 0 : index
    %52 = vector.load %arg7[%c0_30, %c0_31] : memref<16x1xf32, #tpu.memory_space<vmem>>, vector<16x1xf32>
    %53 = vector.broadcast %52 : vector<16x1xf32> to vector<16x256xf32>
    %54 = arith.addf %51, %53 : vector<16x256xf32>
    %cst_32 = arith.constant 0.000000e+00 : f32
    %55 = vector.broadcast %cst_32 : f32 to vector<16x256xf32>
    %56 = arith.maximumf %54, %55 : vector<16x256xf32>
    %c0_33 = arith.constant 0 : index
    %c0_34 = arith.constant 0 : index
    %57 = vector.load %arg8[%c0_33, %c0_34] : memref<8x16xf32, #tpu.memory_space<vmem>>, vector<8x16xf32>
    %cst_35 = arith.constant dense<0.000000e+00> : vector<8x256xf32>
    %58 = tpu.matmul %57, %56, %cst_35 {dimension_numbers = #tpu.dot_dimension_numbers<[1], [0], [0], [1], [0, 0, 1, 1], [], []>} : vector<8x16xf32>, vector<16x256xf32>, vector<8x256xf32> -> vector<8x256xf32>
    %cst_36 = arith.constant 3.000000e-01 : f32
    %59 = vector.broadcast %cst_36 : f32 to vector<8x256xf32>
    %60 = arith.mulf %59, %58 : vector<8x256xf32>
    %61 = arith.subf %1, %60 : vector<8x256xf32>
    %c0_37 = arith.constant 0 : index
    %c0_38 = arith.constant 0 : index
    %c0_39 = arith.constant 0 : index
    %62 = vector.load %arg9[%c0_37, %c0_38, %c0_39] : memref<1x8x256xf32, #tpu.memory_space<vmem>>, vector<1x8x256xf32>
    %63 = vector.shape_cast %62 : vector<1x8x256xf32> to vector<8x256xf32>
    %64 = vector.shape_cast %61 : vector<8x256xf32> to vector<1x8x256xf32>
    tpu.vector_store %arg9[%c0_37, %c0_38, %c0_39], %64 {strides = array<i32>} : memref<1x8x256xf32, #tpu.memory_space<vmem>>, vector<1x8x256xf32>,
    return
  }
  func.func @transform_0(%arg0: i32) -> (i32, i32, i32) {
    %c0_i32 = arith.constant 0 : i32
    %c0_i32_0 = arith.constant 0 : i32
    %c0_i32_1 = arith.constant 0 : i32
    return %arg0, %c0_i32, %c0_i32_0 : i32, i32, i32
  }
  func.func @transform_1(%arg0: i32) -> (i32, i32, i32) {
    %c0_i32 = arith.constant 0 : i32
    %c0_i32_0 = arith.constant 0 : i32
    %c0_i32_1 = arith.constant 0 : i32
    return %arg0, %c0_i32, %c0_i32_0 : i32, i32, i32
  }
  func.func @transform_2(%arg0: i32) -> (i32, i32) {
    %c0_i32 = arith.constant 0 : i32
    %c0_i32_0 = arith.constant 0 : i32
    %c0_i32_1 = arith.constant 0 : i32
    return %c0_i32, %c0_i32_0 : i32, i32
  }
  func.func @transform_3(%arg0: i32) -> (i32, i32, i32) {
    %c0_i32 = arith.constant 0 : i32
    %c0_i32_0 = arith.constant 0 : i32
    %c0_i32_1 = arith.constant 0 : i32
    %c0_i32_2 = arith.constant 0 : i32
    return %c0_i32, %c0_i32_0, %c0_i32_1 : i32, i32, i32
  }
  func.func @transform_4(%arg0: i32) -> (i32, i32) {
    %c0_i32 = arith.constant 0 : i32
    %c0_i32_0 = arith.constant 0 : i32
    %c0_i32_1 = arith.constant 0 : i32
    return %c0_i32, %c0_i32_0 : i32, i32
  }
  func.func @transform_5(%arg0: i32) -> (i32, i32) {
    %c0_i32 = arith.constant 0 : i32
    %c0_i32_0 = arith.constant 0 : i32
    %c0_i32_1 = arith.constant 0 : i32
    return %c0_i32, %c0_i32_0 : i32, i32
  }
  func.func @transform_6(%arg0: i32) -> (i32, i32) {
    %c0_i32 = arith.constant 0 : i32
    %c0_i32_0 = arith.constant 0 : i32
    %c0_i32_1 = arith.constant 0 : i32
    return %c0_i32, %c0_i32_0 : i32, i32
  }
  func.func @transform_7(%arg0: i32) -> (i32, i32) {
    %c0_i32 = arith.constant 0 : i32
    %c0_i32_0 = arith.constant 0 : i32
    %c0_i32_1 = arith.constant 0 : i32
    return %c0_i32, %c0_i32_0 : i32, i32
  }
  func.func @transform_8(%arg0: i32) -> (i32, i32, i32) {
    %c0_i32 = arith.constant 0 : i32
    %c0_i32_0 = arith.constant 0 : i32
    %c0_i32_1 = arith.constant 0 : i32
    return %arg0, %c0_i32, %c0_i32_0 : i32, i32, i32
  }
}

</mosaic_0001>

<bundles_post_ra>
// kernel: tpu_custom_call.1
= control target key start
LH: loop header
LB: loop body
LE: loop exit
PB: predicated region body
PF: predicated region fallthrough
CT: control target
= control target key end

     0   :  { %13 = vsyncpa [#allocation3], 0  ;;  %s1051_s0 = inlined_call_operand.hbm [shape: f32[1,8,256], index: 0, kind: input, shape index: {}]   ;;  %s1052_s1 = inlined_call_operand.hbm [shape: f32[1,8,256], index: 1, kind: input, shape index: {}]   ;;  %s1053_s2 = inlined_call_operand.hbm [shape: f32[8,8], index: 2, kind: input, shape index: {}]   ;;  %s1054_s3 = inlined_call_operand.vmem [shape: f32[9,1,256], index: 3, kind: input, shape index: {}]   ;;  %s1055_s4 = inlined_call_operand.hbm [shape: f32[16,72], index: 4, kind: input, shape index: {}]   ;;  %s1056_s5 = inlined_call_operand.vmem [shape: f32[16,16], index: 5, kind: input, shape index: {}]   ;;  %s1057_s6 = inlined_call_operand.vmem [shape: f32[16,1], index: 6, kind: input, shape index: {}]   ;;  %s1058_s7 = inlined_call_operand.vmem [shape: f32[8,16], index: 7, kind: input, shape index: {}]   ;;  %s1059_s8 = inlined_call_operand.hbm [shape: f32[1,8,256], index: 8, kind: output, shape index: {}]  }
   0x1   :  { %14 = vsyncpa [#allocation6], 0 }
   0x2   :  { %15 = vsyncpa [#allocation9], 0 }
   0x3   :  { %16 = vsyncpa [#allocation4], 0  ;;  %s798_s27 = smov [#allocation5]   ;;  %s799_s29 = smov [#allocation2]  }
   0x4   :  { %s33_s28 = sshll.u32 %s798_s27, 4  ;;  %s23_s30 = sshll.u32 %s799_s29, 4  ;;  %s34_s28 = int_to_ptr.vmem [resolvable:$true] %s33_s28  ;;  %s24_s30 = int_to_ptr.vmem [resolvable:$true] %s23_s30 }
   0x5   :  { %s680_s11 = scalar_lea.hbm %s1052_s1, 256 }
   0x6   :  { %p681_p0 = scmp.ne.s32.totalorder %s1052_s1, %s680_s11  ;;  %p684_p1 = scmp.lt.u32.totalorder %s680_s11, %s1052_s1 }
   0x8   :  { %p686_p2 = pnand %p684_p1, %p681_p0 }
   0xa   :  { %689 = shalt.err (!%p686_p2)
}
   0xb   :  { %s690_s16 = scalar_lea.vmem %s34_s28, 256  ;;  %p695_p4 = scmp.lt.s32.totalorder %s34_s28, %s34_s28 }
   0xc   :  { %p691_p3 = scmp.ne.s32.totalorder %s34_s28, %s690_s16  ;;  %p696_p5 = scmp.lt.s32.totalorder %s690_s16, %s690_s16 }
   0xe   :  { %p697_p6 = por %p696_p5, %p695_p4 }
  0x10   :  { %p698_p7 = pnand %p697_p6, %p691_p3 }
  0x12   :  { %701 = shalt.err (!%p698_p7)
}
  0x13   :  { %36 = dma.hbm_to_vmem [thread:$0]  %s1052_s1, 256, %s34_s28, [#allocation6]  }
  0x14   :  { %s702_s21 = scalar_lea.hbm %s1051_s0, 256 }
  0x15   :  { %p703_p8 = scmp.ne.s32.totalorder %s1051_s0, %s702_s21  ;;  %p706_p9 = scmp.lt.u32.totalorder %s702_s21, %s1051_s0 }
  0x17   :  { %p708_p10 = pnand %p706_p9, %p703_p8 }
  0x19   :  { %711 = shalt.err (!%p708_p10)
}
  0x1a   :  { %s712_s26 = scalar_lea.vmem %s24_s30, 256  ;;  %p717_p12 = scmp.lt.s32.totalorder %s24_s30, %s24_s30 }
  0x1b   :  { %p713_p11 = scmp.ne.s32.totalorder %s24_s30, %s712_s26  ;;  %p718_p13 = scmp.lt.s32.totalorder %s712_s26, %s712_s26 }
  0x1d   :  { %p719_p0 = por %p718_p13, %p717_p12 }
  0x1f   :  { %p720_p1 = pnand %p719_p0, %p713_p11 }
  0x21   :  { %723 = shalt.err (!%p720_p1)
}
  0x22   :  { %26 = dma.hbm_to_vmem [thread:$0]  %s1051_s0, 256, %s24_s30, [#allocation3]  }
  0x23   :  { %s800_s28 = smov [#allocation7]   ;;  %s801_s9 = smov [#allocation8]  }
  0x24   :  { %s43_s29 = sshll.u32 %s800_s28, 4  ;;  %s54_s10 = sshll.u32 %s801_s9, 4  ;;  %s44_s29 = int_to_ptr.vmem [resolvable:$true] %s43_s29  ;;  %s884_s10 = int_to_ptr.vmem [resolvable:$true] %s54_s10 }
  0x25   :  { %s724_s13 = scalar_lea.hbm %s1053_s2, 128 }
  0x26   :  { %p725_p2 = scmp.ne.s32.totalorder %s1053_s2, %s724_s13  ;;  %p728_p3 = scmp.lt.u32.totalorder %s724_s13, %s1053_s2 }
  0x28   :  { %p730_p4 = pnand %p728_p3, %p725_p2 }
  0x2a   :  { %733 = shalt.err (!%p730_p4)
}
  0x2b   :  { %s734_s0 = scalar_lea.vmem %s44_s29, 128  ;;  %p739_p6 = scmp.lt.s32.totalorder %s44_s29, %s44_s29 }
  0x2c   :  { %p735_p5 = scmp.ne.s32.totalorder %s44_s29, %s734_s0  ;;  %p740_p7 = scmp.lt.s32.totalorder %s734_s0, %s734_s0 }
  0x2e   :  { %p741_p8 = por %p740_p7, %p739_p6 }
  0x30   :  { %p742_p9 = pnand %p741_p8, %p735_p5 }
  0x32   :  { %745 = shalt.err (!%p742_p9)
}
  0x33   :  { %46 = dma.hbm_to_vmem [thread:$0]  %s1053_s2, 128, %s44_s29, [#allocation6]  }
  0x34   :  { %s746_s21 = scalar_lea.hbm %s1055_s4, 256 }
  0x35   :  { %p747_p10 = scmp.ne.s32.totalorder %s1055_s4, %s746_s21  ;;  %p750_p11 = scmp.lt.u32.totalorder %s746_s21, %s1055_s4 }
  0x37   :  { %p752_p12 = pnand %p750_p11, %p747_p10 }
  0x39   :  { %755 = shalt.err (!%p752_p12)
}
  0x3a   :  { %s756_s26 = scalar_lea.vmem %s884_s10, 256  ;;  %p761_p0 = scmp.lt.s32.totalorder %s884_s10, %s884_s10 }
  0x3b   :  { %p757_p13 = scmp.ne.s32.totalorder %s884_s10, %s756_s26  ;;  %p762_p1 = scmp.lt.s32.totalorder %s756_s26, %s756_s26 }
  0x3d   :  { %p763_p2 = por %p762_p1, %p761_p0 }
  0x3f   :  { %p764_p3 = pnand %p763_p2, %p757_p13 }
  0x41   :  { %767 = shalt.err (!%p764_p3)
}
  0x42   :  { %s802_s2 = smov 128   ;;  %s803_s1 = smov 8  }
  0x43   :  { %60 = dma.hbm_to_vmem [thread:$0]  %s1055_s4, 256, %s884_s10, [#allocation9], %s802_s2, %s802_s2, %s803_s1  }
  0x44   :  { %790 = dma.done.wait [#allocation3], 256  }
  0x45   :  { %791 = vsyncadd [#allocation3], 4294967040 }
  0x46   :  { %792 = dma.done.wait [#allocation6], 384  }
  0x47   :  { %793 = vsyncadd [#allocation6], 4294966912 }
  0x48   :  { %794 = dma.done.wait [#allocation9], 256  }
  0x49   :  { %795 = vsyncadd [#allocation9], 4294967040  ;;  %v804_v0 = vmov 0.0   ;;  %v917_v1 = vld [vmem:[#allocation2 + $0x8] sm:$0xff]  ;;  %v919_v2 = vld [vmem:[#allocation2] sm:$0xff]  ;;  %vm84_vm0 = vcmask 64512   ;;  %v165_v10 = vlaneseq }
  0x4a   :  { %152 = vmatprep.mubr.f32.mxu0 %v804_v0  ;;  %411 = vmatprep.mubr.f32.mxu1 %v804_v0  ;;  %v83_v3 = vld [vmem:[#allocation7] sm:$0xff]  ;;  %v81_v4 = vld [vmem:[#allocation5] sm:$0xff]  ;;  %v82_v8 = vld [vmem:[#allocation5 + $0x8] sm:$0xff]  ;;  %s805_s4 = smov 16   ;;  %s806_s29 = smov 17   ;;  %vm340_vm9 = vcmask 588800  }
  0x4b   :  { %88 = vmatprep.subr.mxu0 %v917_v1  ;;  %s807_s9 = smov 15   ;;  %s808_s10 = smov 1   ;;  %v173_v13 = vshrl.u32 %v165_v10, 7  ;;  %v944_v14 = vand.u32 127, %v165_v10  ;;  %v625_v19 = vld [vmem:[%s1054_s3 + $0x2] sm:$0x3] }
  0x4c   :  { %89 = vmatpush1.msra.mxu0 %v919_v2  ;;  %s809_s11 = smov 127   ;;  %s810_s12 = smov 113   ;;  %v627_v20 = vld [vmem:[%s1054_s3 + $0x6] sm:$0x3]  ;;  %v170_v21 = vld [vmem:[%s1054_s3] sm:$0x3] }
  0x4d   :  { %624 = vmatmul.mubr.msk.f32.vlgmr.msra.gmra.mrb[0].mxu0 %vm84_vm0, %v83_v3  ;;  %s811_s13 = smov 112   ;;  %s812_s14 = smov 111   ;;  %v946_v16 = vsub.s32 0, %v173_v13  ;;  %v948_v18 = vsub.s32 1, %v173_v13  ;;  %vm188_vm1 = vcmp.lt.s32.totalorder %v944_v14, 16  ;;  %vm210_vm2 = vcmp.lt.s32.totalorder %v944_v14, 15 }
  0x4e   :  { %509 = vmatprep.mubr.f32.mxu0 %v804_v0  ;;  %v626_v24 = vld [vmem:[%s1054_s3 + $0x4] sm:$0x3]  ;;  %vm232_vm3 = vcmp.lt.s32.totalorder %v944_v14, 1  ;;  %v628_v29 = vld [vmem:[%s1054_s3 + $0xa] sm:$0x3]  ;;  %vm167_vm4 = vcmp.lt.s32.totalorder %v944_v14, 17 }
  0x4f   :  { %v197_v22 = vrot.slane %v625_v19, %v946_v16  ;;  %v201_v26 = vrot.slane %v625_v19, %v948_v18  ;;  %v245_v30 = vrot.slane %v627_v20, %v948_v18  ;;  %v175_v31 = vrot.slane %v170_v21, %v946_v16  ;;  %v629_v61 = vld [vmem:[%s1054_s3 + $0xc] sm:$0x3]  ;;  %v630_v63 = vld [vmem:[%s1054_s3 + $0xe] sm:$0x3] }
  0x50   :  { %v179_v32 = vrot.slane %v170_v21, %v948_v18  ;;  %v223_v33 = vrot.slane %v626_v24, %v948_v18  ;;  %v241_v34 = vrot.slane %v627_v20, %v946_v16  ;;  %vm254_vm5 = vcmp.lt.s32.totalorder %v944_v14, 127 }
  0x51   :  { %v267_v38 = vrot.slane %v628_v29, %v948_v18  ;;  %v219_v48 = vrot.slane %v626_v24, %v946_v16  ;;  %v263_v56 = vrot.slane %v628_v29, %v946_v16  ;;  %vm276_vm6 = vcmp.lt.s32.totalorder %v944_v14, 113 }
  0x52   :  { %vm298_vm7 = vcmp.lt.s32.totalorder %v944_v14, 112  ;;  %v311_v13 = vrot.slane %v630_v63, %v948_v18  ;;  %vm320_vm8 = vcmp.lt.s32.totalorder %v944_v14, 111  ;;  %v427_v14 = vld [vmem:[%s1057_s6 + $0x8] sm:$0xff]  ;;  %vm438_vm10 = vcmask 130048  }
 0x120   :  { %v154_v5 = vpop.f32.mrb[0].mxu0 }
 0x121   :  { %v924_v6 = vsub.f32 %v154_v5, %v81_v4  ;;  %v156_v7 = vpop.f32.mrb[1].mxu0 }
 0x122   :  { %v928_v9 = vsub.f32 %v156_v7, %v82_v8  ;;  %v285_v7 = vrot.slane %v629_v61, %v946_v16  ;;  %v289_v8 = vrot.slane %v629_v61, %v948_v18 }
 0x123   :  { %184 = vrot.lane.b32.xlu1 %v924_v6, %s805_s4  ;;  %161 = vrot.lane.b32.xlu0 %v924_v6, %s806_s29 }
 0x127   :  { %206 = vrot.lane.b32.xlu0 %v924_v6, %s807_s9  ;;  %186 = vrot.lane.b32.xlu1 %v928_v9, %s805_s4 }
 0x12b   :  { %228 = vrot.lane.b32.xlu0 %v924_v6, %s808_s10  ;;  %208 = vrot.lane.b32.xlu1 %v928_v9, %s807_s9 }
 0x12f   :  { %230 = vrot.lane.b32.xlu1 %v928_v9, %s808_s10  ;;  %163 = vrot.lane.b32.xlu0 %v928_v9, %s806_s29 }
 0x133   :  { %252 = vrot.lane.b32.xlu1 %v928_v9, %s809_s11  ;;  %250 = vrot.lane.b32.xlu0 %v924_v6, %s809_s11 }
 0x137   :  { %274 = vrot.lane.b32.xlu1 %v928_v9, %s810_s12  ;;  %272 = vrot.lane.b32.xlu0 %v924_v6, %s810_s12  ;;  %s814_s12 = smov [#allocation10]  }
 0x13b   :  { %296 = vrot.lane.b32.xlu1 %v928_v9, %s811_s13  ;;  %294 = vrot.lane.b32.xlu0 %v924_v6, %s811_s13  ;;  %s613_s13 = sshll.u32 %s814_s12, 4  ;;  %s614_s13 = int_to_ptr.vmem [resolvable:$true] %s613_s13 }
 0x13c   :  { %p773_p5 = scmp.lt.s32.totalorder %s614_s13, %s614_s13 }
 0x13f   :  { %318 = vrot.lane.b32.xlu1 %v928_v9, %s812_s14  ;;  %316 = vrot.lane.b32.xlu0 %v924_v6, %s812_s14  ;;  %s768_s14 = scalar_lea.vmem %s614_s13, 256 }
 0x140   :  { %p769_p4 = scmp.ne.s32.totalorder %s614_s13, %s768_s14  ;;  %p774_p6 = scmp.lt.s32.totalorder %s768_s14, %s768_s14 }
 0x142   :  { %p775_p7 = por %p774_p6, %p773_p5 }
 0x144   :  { %p776_p8 = pnand %p775_p7, %p769_p4 }
 0x195   :  { %v185_v11 = vpop.permute.xlu1 %184  ;;  %v162_v12 = vpop.permute.xlu0 %161 }
 0x199   :  { %v207_v15 = vpop.permute.xlu0 %206  ;;  %v187_v17 = vpop.permute.xlu1 %186 }
 0x19a   :  { %v189_v27 = vsel %vm188_vm1, %v185_v11, %v187_v17  ;;  %v190_v28 = vsel %vm188_vm1, %v187_v17, %v185_v11 }
 0x19b   :  { %v204_v35 = vmul.f32 %v197_v22, %v190_v28  ;;  %v205_v39 = vmul.f32 %v201_v26, %v189_v27 }
 0x19d   :  { %v229_v23 = vpop.permute.xlu0 %228  ;;  %v209_v25 = vpop.permute.xlu1 %208 }
 0x19e   :  { %v211_v40 = vsel %vm210_vm2, %v207_v15, %v209_v25  ;;  %v212_v49 = vsel %vm210_vm2, %v209_v25, %v207_v15  ;;  %v631_v15 = vld [vmem:[%s1054_s3 + $0x10] sm:$0x3] }
 0x19f   :  { %v227_v50 = vmul.f32 %v223_v33, %v211_v40  ;;  %v226_v62 = vmul.f32 %v219_v48, %v212_v49  ;;  %v333_v24 = vrot.slane %v631_v15, %v948_v18  ;;  %v329_v33 = vrot.slane %v631_v15, %v946_v16 }
 0x1a1   :  { %v231_v36 = vpop.permute.xlu1 %230  ;;  %v164_v37 = vpop.permute.xlu0 %163 }
 0x1a2   :  { %v233_v41 = vsel %vm232_vm3, %v229_v23, %v231_v36  ;;  %v168_v42 = vsel %vm167_vm4, %v162_v12, %v164_v37  ;;  %v169_v43 = vsel %vm167_vm4, %v164_v37, %v162_v12  ;;  %v234_v44 = vsel %vm232_vm3, %v231_v36, %v229_v23  ;;  %v338_v36 = vld [vmem:[#allocation8] sm:$0xff]  ;;  %v339_v37 = vld [vmem:[#allocation8 + $0x8] sm:$0xff] }
 0x1a3   :  { %v249_v45 = vmul.f32 %v245_v30, %v233_v41  ;;  %v182_v46 = vmul.f32 %v175_v31, %v169_v43  ;;  %v183_v47 = vmul.f32 %v179_v32, %v168_v42  ;;  %v248_v55 = vmul.f32 %v241_v34, %v234_v44 }
 0x1a4   :  { %v307_v12 = vrot.slane %v630_v63, %v946_v16  ;;  %v426_v16 = vld [vmem:[%s1057_s6] sm:$0xff] }
 0x1a5   :  { %v253_v51 = vpop.permute.xlu1 %252  ;;  %v251_v52 = vpop.permute.xlu0 %250  ;;  %v637_v53 = vpack.c.bf16 %v205_v39, %v183_v47  ;;  %v639_v54 = vpack.c.bf16 %v204_v35, %v182_v46  ;;  %v641_v60 = vpack.c.bf16 %v249_v45, %v227_v50  ;;  %v643_v10 = vpack.c.bf16 %v248_v55, %v226_v62  ;;  %v424_v45 = vld [vmem:[%s1056_s5] sm:$0xff]  ;;  %v425_v46 = vld [vmem:[%s1056_s5 + $0x8] sm:$0xff] }
 0x1a6   :  { %v256_v57 = vsel %vm254_vm5, %v253_v51, %v251_v52  ;;  %v255_v58 = vsel %vm254_vm5, %v251_v52, %v253_v51 }
 0x1a7   :  { %v271_v59 = vmul.f32 %v267_v38, %v256_v57  ;;  %638 = vmatprep.subr.bf16.mxu1 %v637_v53  ;;  %v270_v5 = vmul.f32 %v263_v56, %v255_v58  ;;  %v813_v38 = vmov 0  }
 0x1a8   :  { %640 = vmatpush1.bf16.msra.mxu1 %v639_v54  ;;  %678 = vset.pattern.permute.xlu0 %v813_v38 }
 0x1a9   :  { %v275_v3 = vpop.permute.xlu1 %274  ;;  %642 = vmatprep.subr.bf16.mxu1 %v641_v60  ;;  %v273_v4 = vpop.permute.xlu0 %272  ;;  %v645_v11 = vpack.c.bf16 %v271_v59, %v928_v9  ;;  %v647_v23 = vpack.c.bf16 %v270_v5, %v924_v6  ;;  %679 = vset.pattern.permute.xlu1 %v813_v38 }
 0x1aa   :  { %v277_v17 = vsel %vm276_vm6, %v273_v4, %v275_v3  ;;  %v278_v19 = vsel %vm276_vm6, %v275_v3, %v273_v4  ;;  %430 = vperm.xlu0 %678, %v426_v16   ;;  %435 = vperm.xlu1 %679, %v427_v14  }
 0x1ab   :  { %v292_v25 = vmul.f32 %v285_v7, %v277_v17  ;;  %v293_v26 = vmul.f32 %v289_v8, %v278_v19 }
 0x1ac   :  { %644 = vmatpush1.bf16.msra.mxu1 %v643_v10 }
 0x1ad   :  { %v297_v20 = vpop.permute.xlu1 %296  ;;  %646 = vmatprep.subr.bf16.mxu1 %v645_v11  ;;  %v295_v21 = vpop.permute.xlu0 %294 }
 0x1ae   :  { %v299_v22 = vsel %vm298_vm7, %v295_v21, %v297_v20  ;;  %v300_v9 = vsel %vm298_vm7, %v297_v20, %v295_v21 }
 0x1af   :  { %v314_v27 = vmul.f32 %v307_v12, %v299_v22  ;;  %v315_v28 = vmul.f32 %v311_v13, %v300_v9 }
 0x1b0   :  { %648 = vmatpush1.bf16.msra.mxu1 %v647_v23 }
 0x1b1   :  { %v319_v29 = vpop.permute.xlu1 %318  ;;  %v317_v30 = vpop.permute.xlu0 %316  ;;  %v649_v31 = vpack.c.bf16 %v315_v28, %v293_v26  ;;  %v651_v32 = vpack.c.bf16 %v314_v27, %v292_v25 }
 0x1b2   :  { %v322_v34 = vsel %vm320_vm8, %v319_v29, %v317_v30  ;;  %v321_v35 = vsel %vm320_vm8, %v317_v30, %v319_v29 }
 0x1b3   :  { %v337_v6 = vmul.f32 %v333_v24, %v322_v34  ;;  %650 = vmatprep.subr.bf16.mxu1 %v649_v31  ;;  %v336_v18 = vmul.f32 %v329_v33, %v321_v35 }
 0x1b4   :  { %652 = vmatpush1.bf16.msra.mxu1 %v651_v32 }
 0x1b5   :  { %363 = vmatprep.subr.mxu1 %v337_v6 }
 0x1b8   :  { %364 = vmatpush1.msra.mxu1 %v336_v18 }
 0x1b9   :  { %632 = vmatmul.mubr.msk.f32.vlgmr.msra.gmra.mrb[0].mxu1 %vm340_vm9, %v338_v36 }
 0x1ba   :  { %417 = vmatprep.mubr.f32.mxu1 %v804_v0 }
 0x1bd   :  { %633 = vmatmul.mubr.msk.f32.gmra.mrb[2].mxu1 %vm340_vm9, %v339_v37 }
 0x229   :  { %v431_v48 = vpop.permute.xlu0 %430  ;;  %v436_v50 = vpop.permute.xlu1 %435 }
 0x28c   :  { %v413_v39 = vpop.f32.mrb[0].mxu1 }
 0x28d   :  { %v415_v40 = vpop.f32.mrb[1].mxu1 }
 0x290   :  { %v419_v41 = vpop.f32.mrb[2].mxu1 }
 0x291   :  { %v655_v42 = vpack.c.bf16 %v419_v41, %v413_v39  ;;  %v421_v43 = vpop.f32.mrb[3].mxu1 }
 0x292   :  { %v653_v44 = vpack.c.bf16 %v421_v43, %v415_v40 }
 0x294   :  { %654 = vmatprep.subr.bf16.mxu0 %v653_v44 }
 0x295   :  { %656 = vmatpush1.bf16.msra.mxu0 %v655_v42 }
 0x298   :  { %634 = vmatmul.mubr.msk.f32.vlgmr.msra.gmra.mrb[2].mxu0 %vm438_vm10, %v424_v45 }
 0x299   :  { %515 = vmatprep.mubr.f32.mxu0 %v804_v0 }
 0x29c   :  { %635 = vmatmul.mubr.msk.f32.gmra.mrb[4].mxu0 %vm438_vm10, %v425_v46 }
 0x29d   :  { %594 = vmatprep.mubr.f32.mxu0 %v804_v0  ;;  %v526_v0 = vld [vmem:[%s1058_s7] sm:$0xff] }
 0x36b   :  { %v511_v47 = vpop.f32.mrb[2].mxu0 }
 0x36c   :  { %v513_v49 = vpop.f32.mrb[3].mxu0  ;;  %v512_v51 = vadd.f32 %v511_v47, %v431_v48 }
 0x36d   :  { %v514_v52 = vadd.f32 %v513_v49, %v431_v48 }
 0x36e   :  { %v522_v57 = vmax.f32 %v512_v51, 0.0 }
 0x36f   :  { %v517_v53 = vpop.f32.mrb[4].mxu0  ;;  %v523_v59 = vmax.f32 %v514_v52, 0.0 }
 0x370   :  { %v518_v54 = vadd.f32 %v517_v53, %v436_v50  ;;  %v519_v55 = vpop.f32.mrb[5].mxu0 }
 0x371   :  { %v520_v56 = vadd.f32 %v519_v55, %v436_v50 }
 0x372   :  { %v524_v58 = vmax.f32 %v518_v54, 0.0 }
 0x373   :  { %v525_v60 = vmax.f32 %v520_v56, 0.0 }
 0x374   :  { %v659_v61 = vpack.c.bf16 %v524_v58, %v522_v57 }
 0x375   :  { %v657_v62 = vpack.c.bf16 %v525_v60, %v523_v59 }
 0x377   :  { %658 = vmatprep.subr.bf16.mxu0 %v657_v62 }
 0x378   :  { %660 = vmatpush1.bf16.msra.mxu0 %v659_v61 }
 0x37b   :  { %636 = vmatmul.mubr.msk.f32.vlgmr.msra.gmra.mrb[6].mxu0 %vm438_vm10, %v526_v0 }
 0x44e   :  { %v596_v63 = vpop.f32.mrb[6].mxu0 }
 0x44f   :  { %v601_v3 = vmul.f32 0.3, %v596_v63  ;;  %v598_v4 = vpop.f32.mrb[7].mxu0 }
 0x450   :  { %v602_v5 = vmul.f32 0.3, %v598_v4 }
 0x451   :  { %v603_v7 = vsub.f32 %v919_v2, %v601_v3 }
 0x452   :  { %v604_v8 = vsub.f32 %v917_v1, %v602_v5 }
 0x453   :  { %605 = vst [vmem:[#allocation10] sm:$0xff] %v603_v7 }
 0x454   :  { %606 = vst [vmem:[#allocation10 + $0x8] sm:$0xff] %v604_v8 }
 0x455   :  { %779 = shalt.err (!%p776_p8)
}
 0x456   :  { %s780_s16 = scalar_lea.hbm %s1059_s8, 256 }
 0x457   :  { %p781_p9 = scmp.ne.s32.totalorder %s1059_s8, %s780_s16  ;;  %p784_p10 = scmp.lt.u32.totalorder %s780_s16, %s1059_s8 }
 0x459   :  { %p786_p11 = pnand %p784_p10, %p781_p9 }
 0x45b   :  { %789 = shalt.err (!%p786_p11)
}
 0x45c   :  { %616 = dma.vmem_to_hbm [thread:$0]  %s614_s13, 256, %s1059_s8, [#allocation4]  }
 0x45d   :  { %796 = dma.done.wait [#allocation4], 256  }
 0x45e   :  { %797 = vsyncadd [#allocation4], 4294967040 }
 0x45f   :  { %620 = vsyncpa [#allocation3], 1 }
 0x460   :  { %621 = vsyncpa [#allocation6], 1 }
 0x461   :  { %622 = vsyncpa [#allocation9], 1 }
 0x462   :  { %623 = vsyncpa [#allocation4], 1 }

</bundles_post_ra>
